<compile_context>
chip_gen: v7x
topology: tpu7x:2x2x1
jax: 0.10.0
libtpu: 0.0.40
codegen_flags: <defaults>
</compile_context>

<pallas_src>
import functools
import math

import jax
import jax.numpy as jnp
from jax.experimental import pallas as pl
from jax.experimental.pallas import tpu as pltpu


def _ca_kernel(x_ref, w1_ref, b1_ref, w2_ref, b2_ref, o_ref, *, inv_hw, bn):
    # x_ref : (bn, C, HW)  lane-dense spatial slabs for bn batch elements
    # w1_ref: (mid, C)   b1_ref: (mid, 1)
    # w2_ref: (C, mid)   b2_ref: (C, 1)
    # o_ref : (bn, C, HW)
    w1 = w1_ref[...]
    b1 = b1_ref[...]
    w2 = w2_ref[...]
    b2 = b2_ref[...]

    # Static unroll over the (small) batch block.
    for b in range(bn):
        x = x_ref[b]                                          # (C, HW)

        # Global average pool over the spatial (lane) axis -> (C, 1).
        pooled = jnp.sum(x, axis=1, keepdims=True) * inv_hw

        # Squeeze: 1x1 conv == FC (C -> mid) + bias, ReLU.
        y = jnp.dot(w1, pooled, preferred_element_type=jnp.float32)
        y = jnp.maximum(y + b1, 0.0)                          # (mid, 1)

        # Excite: 1x1 conv == FC (mid -> C) + bias, sigmoid.
        z = jnp.dot(w2, y, preferred_element_type=jnp.float32) + b2
        scale = 1.0 / (1.0 + jnp.exp(-z))                     # (C, 1)

        # Channel-wise rescale; (C,1) broadcasts over the lane-dense spatial axis.
        o_ref[b] = (x * scale).astype(o_ref.dtype)


def _pick_batch_block(n, c, hw, itemsize):
    """Largest batch block that fits the VMEM budget, divides N, and keeps
    >= 2 grid steps (so both v7x TensorCores get work)."""
    # x block + out block, each double-buffered by the pipeline.
    per_n = 4 * c * hw * itemsize
    budget = 8 * 1024 * 1024  # conservative: below every chip's scoped-VMEM default
    bn = max(1, min(n, budget // max(per_n, 1)))
    if n > 1:
        bn = min(bn, max(1, n // 2))   # keep at least 2 grid steps
    while n % bn:                      # keep every block full (exact, simple)
        bn -= 1
    return bn


def ca_layer(x_nchw, w1, b1, w2, b2):
    """CALayer forward.

    x_nchw: (N, C, H, W) float32
    w1: (C//r, C)  b1: (C//r,)   -- first 1x1 conv (weights flattened)
    w2: (C, C//r)  b2: (C,)      -- second 1x1 conv
    """
    N, C, H, W = x_nchw.shape
    mid = w1.shape[0]
    HW = H * W

    x_flat = x_nchw.reshape(N, C, HW)        # free: NCHW is already contiguous
    b1c = b1.reshape(mid, 1)
    b2c = b2.reshape(C, 1)

    bn = _pick_batch_block(N, C, HW, x_nchw.dtype.itemsize)
    grid_n = N // bn

    kern = functools.partial(_ca_kernel, inv_hw=1.0 / float(HW), bn=bn)
    out_flat = pl.pallas_call(
        kern,
        out_shape=jax.ShapeDtypeStruct((N, C, HW), x_nchw.dtype),
        grid_spec=pltpu.PrefetchScalarGridSpec(
            num_scalar_prefetch=0,
            grid=(grid_n,),
            in_specs=[
                pl.BlockSpec((bn, C, HW), lambda n: (n, 0, 0)),
                pl.BlockSpec((mid, C), lambda n: (0, 0)),   # grid-invariant weights
                pl.BlockSpec((mid, 1), lambda n: (0, 0)),
                pl.BlockSpec((C, mid), lambda n: (0, 0)),
                pl.BlockSpec((C, 1), lambda n: (0, 0)),
            ],
            out_specs=pl.BlockSpec((bn, C, HW), lambda n: (n, 0, 0)),
        ),
        compiler_params=pltpu.CompilerParams(
            dimension_semantics=("parallel",)),
    )(x_flat, w1, b1c, w2, b2c)

    return out_flat.reshape(N, C, H, W)


def _reference(x, w1, b1, w2, b2):
    """Pure-JAX re-statement of the PyTorch CALayer forward (verification only)."""
    y = jnp.mean(x, axis=(2, 3), keepdims=True)                        # (N, C, 1, 1)
    y = jnp.einsum('oc,nchw->nohw', w1, y) + b1[None, :, None, None]   # (N, mid, 1, 1)
    y = jnp.maximum(y, 0.0)
    y = jnp.einsum('oc,nchw->nohw', w2, y) + b2[None, :, None, None]   # (N, C, 1, 1)
    y = 1.0 / (1.0 + jnp.exp(-y))
    return x * y


if __name__ == "__main__":
    key = jax.random.PRNGKey(0)
    kx, kw1, kb1, kw2, kb2 = jax.random.split(key, 5)

    # Shapes consistent with CALayer(channel, reduction=16): channel must be a
    # multiple of the reduction, so use channel=64 -> mid=4.
    N, C, H, W = 2, 64, 16, 16
    reduction = 16
    mid = C // reduction

    x = jax.random.normal(kx, (N, C, H, W), dtype=jnp.float32)

    # Deterministic synthetic init matching nn.Conv2d(k=1, bias=True) defaults
    # (kaiming-uniform-style bound = 1/sqrt(fan_in)); no checkpoint load.
    bound1 = 1.0 / math.sqrt(C * 1 * 1)
    bound2 = 1.0 / math.sqrt(mid * 1 * 1)
    w1 = jax.random.uniform(kw1, (mid, C), jnp.float32, -bound1, bound1)
    b1 = jax.random.uniform(kb1, (mid,), jnp.float32, -bound1, bound1)
    w2 = jax.random.uniform(kw2, (C, mid), jnp.float32, -bound2, bound2)
    b2 = jax.random.uniform(kb2, (C,), jnp.float32, -bound2, bound2)

    out = ca_layer(x, w1, b1, w2, b2)
    out = jax.block_until_ready(out)

    ref = _reference(x, w1, b1, w2, b2)
    assert out.shape == (N, C, H, W)
    err = float(jnp.max(jnp.abs(out - ref)))
    assert jnp.allclose(out, ref, atol=1e-5, rtol=1e-5), err
    print("KERNEL_OK")
</pallas_src>

<mosaic_0001>
module attributes {stable_mosaic.version = 11 : i64} {
  func.func @_ca_kernel(%arg0: i32, %arg1: memref<1x64x256xf32, #tpu.memory_space<vmem>>, %arg2: memref<4x64xf32, #tpu.memory_space<vmem>>, %arg3: memref<4x1xf32, #tpu.memory_space<vmem>>, %arg4: memref<64x4xf32, #tpu.memory_space<vmem>>, %arg5: memref<64x1xf32, #tpu.memory_space<vmem>>, %arg6: memref<1x64x256xf32, #tpu.memory_space<vmem>>) attributes {dimension_semantics = [#tpu.dimension_semantics<parallel>], iteration_bounds = array<i64: 2>, scalar_prefetch = 0 : i64, scratch_operands = 0 : i64, tpu.core_type = #tpu.core_type<tc>, window_params = [{transform_indices = @transform_0, window_bounds = array<i64: 1, 64, 256>}, {pipeline_mode = #tpu.pipeline_mode<synchronous>, transform_indices = @transform_1, window_bounds = array<i64: 4, 64>}, {pipeline_mode = #tpu.pipeline_mode<synchronous>, transform_indices = @transform_2, window_bounds = array<i64: 4, 1>}, {pipeline_mode = #tpu.pipeline_mode<synchronous>, transform_indices = @transform_3, window_bounds = array<i64: 64, 4>}, {pipeline_mode = #tpu.pipeline_mode<synchronous>, transform_indices = @transform_4, window_bounds = array<i64: 64, 1>}, {transform_indices = @transform_5, window_bounds = array<i64: 1, 64, 256>}]} {
    %c0 = arith.constant 0 : index
    %c0_0 = arith.constant 0 : index
    %0 = vector.load %arg2[%c0, %c0_0] : memref<4x64xf32, #tpu.memory_space<vmem>>, vector<4x64xf32>
    %c0_1 = arith.constant 0 : index
    %c0_2 = arith.constant 0 : index
    %1 = vector.load %arg3[%c0_1, %c0_2] : memref<4x1xf32, #tpu.memory_space<vmem>>, vector<4x1xf32>
    %c0_3 = arith.constant 0 : index
    %c0_4 = arith.constant 0 : index
    %2 = vector.load %arg4[%c0_3, %c0_4] : memref<64x4xf32, #tpu.memory_space<vmem>>, vector<64x4xf32>
    %c0_5 = arith.constant 0 : index
    %c0_6 = arith.constant 0 : index
    %3 = vector.load %arg5[%c0_5, %c0_6] : memref<64x1xf32, #tpu.memory_space<vmem>>, vector<64x1xf32>
    %c0_7 = arith.constant 0 : index
    %c0_8 = arith.constant 0 : index
    %c0_9 = arith.constant 0 : index
    %4 = vector.load %arg1[%c0_7, %c0_8, %c0_9] : memref<1x64x256xf32, #tpu.memory_space<vmem>>, vector<1x64x256xf32>
    %5 = vector.shape_cast %4 : vector<1x64x256xf32> to vector<64x256xf32>
    %cst = arith.constant dense<0.000000e+00> : vector<64xf32>
    %6 = vector.multi_reduction <add>, %5, %cst [1] : vector<64x256xf32> to vector<64xf32>
    %7 = vector.shape_cast %6 : vector<64xf32> to vector<64x1xf32>
    %cst_10 = arith.constant 3.906250e-03 : f32
    %8 = vector.broadcast %cst_10 : f32 to vector<64x1xf32>
    %9 = arith.mulf %7, %8 : vector<64x1xf32>
    %cst_11 = arith.constant dense<0.000000e+00> : vector<4x1xf32>
    %10 = tpu.matmul %0, %9, %cst_11 {dimension_numbers = #tpu.dot_dimension_numbers<[1], [0], [0], [1], [0, 0, 1, 1], [], []>} : vector<4x64xf32>, vector<64x1xf32>, vector<4x1xf32> -> vector<4x1xf32>
    %11 = arith.addf %10, %1 : vector<4x1xf32>
    %cst_12 = arith.constant 0.000000e+00 : f32
    %12 = vector.broadcast %cst_12 : f32 to vector<4x1xf32>
    %13 = arith.maximumf %11, %12 : vector<4x1xf32>
    %cst_13 = arith.constant dense<0.000000e+00> : vector<64x1xf32>
    %14 = tpu.matmul %2, %13, %cst_13 {dimension_numbers = #tpu.dot_dimension_numbers<[1], [0], [0], [1], [0, 0, 1, 1], [], []>} : vector<64x4xf32>, vector<4x1xf32>, vector<64x1xf32> -> vector<64x1xf32>
    %15 = arith.addf %14, %3 : vector<64x1xf32>
    %cst_14 = arith.constant 0.000000e+00 : f32
    %16 = vector.broadcast %cst_14 : f32 to vector<64x1xf32>
    %17 = arith.subf %16, %15 : vector<64x1xf32>
    %18 = math.exp %17 : vector<64x1xf32>
    %cst_15 = arith.constant 1.000000e+00 : f32
    %19 = vector.broadcast %cst_15 : f32 to vector<64x1xf32>
    %20 = arith.addf %19, %18 : vector<64x1xf32>
    %cst_16 = arith.constant 1.000000e+00 : f32
    %21 = vector.broadcast %cst_16 : f32 to vector<64x1xf32>
    %22 = arith.divf %21, %20 : vector<64x1xf32>
    %23 = vector.broadcast %22 : vector<64x1xf32> to vector<64x256xf32>
    %24 = arith.mulf %5, %23 : vector<64x256xf32>
    %c0_17 = arith.constant 0 : index
    %c0_18 = arith.constant 0 : index
    %c0_19 = arith.constant 0 : index
    %25 = vector.load %arg6[%c0_17, %c0_18, %c0_19] : memref<1x64x256xf32, #tpu.memory_space<vmem>>, vector<1x64x256xf32>
    %26 = vector.shape_cast %25 : vector<1x64x256xf32> to vector<64x256xf32>
    %27 = vector.shape_cast %24 : vector<64x256xf32> to vector<1x64x256xf32>
    tpu.vector_store %arg6[%c0_17, %c0_18, %c0_19], %27 {strides = array<i32>} : memref<1x64x256xf32, #tpu.memory_space<vmem>>, vector<1x64x256xf32>,
    return
  }
  func.func @transform_0(%arg0: i32) -> (i32, i32, i32) {
    %c0_i32 = arith.constant 0 : i32
    %c0_i32_0 = arith.constant 0 : i32
    %c0_i32_1 = arith.constant 0 : i32
    return %arg0, %c0_i32, %c0_i32_0 : i32, i32, i32
  }
  func.func @transform_1(%arg0: i32) -> (i32, i32) {
    %c0_i32 = arith.constant 0 : i32
    %c0_i32_0 = arith.constant 0 : i32
    %c0_i32_1 = arith.constant 0 : i32
    return %c0_i32, %c0_i32_0 : i32, i32
  }
  func.func @transform_2(%arg0: i32) -> (i32, i32) {
    %c0_i32 = arith.constant 0 : i32
    %c0_i32_0 = arith.constant 0 : i32
    %c0_i32_1 = arith.constant 0 : i32
    return %c0_i32, %c0_i32_0 : i32, i32
  }
  func.func @transform_3(%arg0: i32) -> (i32, i32) {
    %c0_i32 = arith.constant 0 : i32
    %c0_i32_0 = arith.constant 0 : i32
    %c0_i32_1 = arith.constant 0 : i32
    return %c0_i32, %c0_i32_0 : i32, i32
  }
  func.func @transform_4(%arg0: i32) -> (i32, i32) {
    %c0_i32 = arith.constant 0 : i32
    %c0_i32_0 = arith.constant 0 : i32
    %c0_i32_1 = arith.constant 0 : i32
    return %c0_i32, %c0_i32_0 : i32, i32
  }
  func.func @transform_5(%arg0: i32) -> (i32, i32, i32) {
    %c0_i32 = arith.constant 0 : i32
    %c0_i32_0 = arith.constant 0 : i32
    %c0_i32_1 = arith.constant 0 : i32
    return %arg0, %c0_i32, %c0_i32_0 : i32, i32, i32
  }
}

</mosaic_0001>

<bundles_post_ra>
// kernel: tpu_custom_call.1
= control target key start
LH: loop header
LB: loop body
LE: loop exit
PB: predicated region body
PF: predicated region fallthrough
CT: control target
= control target key end

     0   :  { %10 = vsyncpa [#allocation3], 0  ;;  %s1351_s0 = inlined_call_operand.hbm [shape: f32[2,64,256], index: 0, kind: input, shape index: {}]   ;;  %s1352_s1 = inlined_call_operand.vmem [shape: f32[4,64], index: 1, kind: input, shape index: {}]   ;;  %s1353_s2 = inlined_call_operand.vmem [shape: f32[4,1], index: 2, kind: input, shape index: {}]   ;;  %s1354_s3 = inlined_call_operand.vmem [shape: f32[64,4], index: 3, kind: input, shape index: {}]   ;;  %s1355_s4 = inlined_call_operand.vmem [shape: f32[64,1], index: 4, kind: input, shape index: {}]   ;;  %s1356_s5 = inlined_call_operand.hbm [shape: f32[2,64,256], index: 5, kind: output, shape index: {}]  }
   0x1   :  { %12 = vsyncpa [#allocation3 + $0x1], 0 }
   0x2   :  { %13 = vsyncpa [#allocation4], 0 }
   0x3   :  { %15 = vsyncpa [#allocation4 + $0x1], 0  ;;  %s1040_s18 = smov 0   ;;  %s1042_s19 = smov 0  }
   0x4   :  { %s1044_s20 = smov 0   ;;  %s1046_s21 = smov 0  }
   0x5 LB: > { %s1061_s22 = sadd.s32 4294967295, %s998_s21   ;;  %s725_s23 = sadd.s32 4294967294, %s998_s21   ;;  %s998_s21 = sphi %s1046_s21, %s1369_s21   ;;  %s994_s20 = sphi %s1044_s20, %s1368_s20   ;;  %s990_s19 = sphi %s1042_s19, %s1367_s19   ;;  %s986_s18 = sphi %s1040_s18, %s1366_s18  }
   0x6   : > { %s1065_s24 = sadd.s32 1, %s998_s21   ;;  %s28_s25 = sadd.s32 1, %s994_s20 }
   0x7   : > { %s25_s26 = ssub.s32 %s998_s21, %s1065_s24  ;;  %p35_p0 = scmp.ne.s32.totalorder %s994_s20, %s990_s19 }
   0x8   : > { %p26_p1 = scmp.eq.s32.totalorder %s25_s26, 0  ;;  %p36_p2 = scmp.eq.s32.totalorder %s998_s21, 0 }
   0x9   : > { %p41_p3 = scmp.ne.s32.totalorder %s990_s19, %s986_s18  ;;  %p42_p4 = scmp.eq.s32.totalorder %s1061_s22, 0 }
   0xa   : > { %s1077_s27 = scalar_select %p26_p1, %s994_s20, %s28_s25  }
   0xb   : > { %p1079_p5 = por %p36_p2, %p35_p0  ;;  %p1083_p6 = por %p42_p4, %p41_p3 }
   0xc   : > { %p149_p7 = scmp.eq.s32.totalorder %s1061_s22, 1  ;;  %p155_p8 = scmp.eq.s32.totalorder %s725_s23, 1 }
   0xd   : > { %p826_p10 = scmp.lt.s32.totalorder %s998_s21, 2  ;;  %s187_s7 = sand.u32 1, %s994_s20  }
   0xe   : > { %p1090_p11 = por %p149_p7, %p35_p0  ;;  %p1094_p12 = por %p155_p8, %p41_p3 }
   0xf   : > { %s749_s8 = sshll.u32 %s998_s21, 11  ;;  %s728_s9 = sshll.u32 %s187_s7, 7 }
  0x10   : > { %s1360_s30 = scalar_select %p1090_p11, 1, 0 }
  0x11   : > { %s1361_s6 = scalar_select %p1094_p12, 1, 0 }
  0x12   : > { %s1103_s12 = scalar_lea.hbm %s1351_s0, %s749_s8  ;;  %s191_s13 = scalar_lea.vmem [#allocation2], %s728_s9 }
  0x13   : > { %s198_s14 = sshll.u32 %s191_s13, 4  ;;  %p1107_p13 = pnand %p826_p10, %p1079_p5  ;;  %s1111_s14 = int_to_ptr.vmem [resolvable:$true] %s198_s14 }
  0x14   : > { %s1113_s16 = scalar_lea.sflag [#allocation3], %s187_s7  ;;  %s902_s17 = scalar_lea.hbm %s1103_s12, 2048 }
  0x15   : > { %p903_p0 = scmp.ne.s32.totalorder %s1103_s12, %s902_s17  ;;  %p904_p1 = pneg %p1107_p13 }
  0x16   : > { %s907_s26 = scalar_lea.hbm %s1351_s0, 4096  ;;  %p908_p4 = scmp.lt.u32.totalorder %s1103_s12, %s1351_s0 }
  0x17   : > { %p905_p2 = pnand %p904_p1, %p903_p0  ;;  %p909_p5 = scmp.lt.u32.totalorder %s907_s26, %s902_s17 }
  0x18   : > { %p911_p8 = scmp.lt.u32.totalorder %s902_s17, %s1103_s12 }
  0x19   : > { %p906_p3 = pneg %p905_p2  ;;  %p910_p7 = por %p909_p5, %p908_p4 }
  0x1b   : > { %p912_p10 = por %p911_p8, %p910_p7 }
  0x1d   : > { %p913_p9 = pnand %p912_p10, %p906_p3 }
  0x1f   : > { %916 = shalt.err (!%p913_p9)
}
  0x20   : > { %s917_s7 = scalar_lea.vmem %s1111_s14, 2048  ;;  %s1000_s9 = smov [#allocation2]  }
  0x21   : > { %p918_p0 = scmp.ne.s32.totalorder %s1111_s14, %s917_s7  ;;  %s922_s10 = sshll.u32 %s1000_s9, 4  ;;  %s923_s10 = int_to_ptr.vmem [resolvable:$false] %s922_s10 }
  0x22   : > { %s924_s11 = scalar_lea.vmem %s923_s10, 4096  ;;  %p925_p11 = scmp.lt.s32.totalorder %s1111_s14, %s923_s10 }
  0x23   : > { %p920_p2 = pnand %p918_p0, %p904_p1  ;;  %p926_p4 = scmp.lt.s32.totalorder %s924_s11, %s917_s7 }
  0x25   : > { %p921_p12 = pneg %p920_p2  ;;  %p927_p5 = por %p926_p4, %p925_p11 }
  0x27   : > { %p928_p7 = pnand %p927_p5, %p921_p12 }
  0x29   : > { %931 = shalt.err (!%p928_p7)
}
  0x2a   : > { %s1001_s13 = smov 256   ;;  %s1002_s17 = smov 16  }
  0x2b   : > { %821 = dma.hbm_to_vmem [thread:$0]  (!%p1107_p13), %s1103_s12, 2048, %s1111_s14, %s1113_s16, %s1001_s13, %s1001_s13, %s1002_s17  }
  0x2c   : > { %p731_p9 = scmp.ge.s32.totalorder %s998_s21, 1  ;;  %p206_p1 = scmp.lt.s32.totalorder %s998_s21, 3 }
  0x2e   : > { %p207_p3 = pnand %p731_p9, %p206_p1 }
  0x2f   : > { %s1144_s23 = sand.u32 (!%p207_p3), 1, %s990_s19  }
  0x30   : > { %210 = sbr.rel (%p207_p3) target bundleno = 854 (0x356), region = 40  ;;  %s732_s25 = sshll.u32 (!%p207_p3), %s1144_s23, 7 }
  0x31   : > { %s213_s26 = scalar_lea.sflag (!%p207_p3), [#allocation3], %s1144_s23  ;;  %s216_s28 = scalar_lea.vmem (!%p207_p3), [#allocation2], %s732_s25 }
  0x37   : > { %977 = dma.done.wait (%p1083_p6), %s213_s26, 2048  }
  0x38   : > { %979 = vsyncadd (%p1083_p6), %s213_s26, 4294965248  ;;  %v1154_v0 = vld [vmem:[%s216_s28 + $0x20] sm:$0xff]  ;;  %v1156_v1 = vld [vmem:[%s216_s28 + $0x28] sm:$0xff]  ;;  %v1003_v24 = vmov 0.0|0.0   ;;  %vm1004_vm0 = vmmov 0   ;;  %v1005_v25 = vmov 0.0  }
  0x39   : > { %v1158_v2 = vld [vmem:[%s216_s28] sm:$0xff]  ;;  %v283_v3 = vadd.f32 %v1156_v1, %v1154_v0  ;;  %v1162_v4 = vld [vmem:[%s216_s28 + $0x8] sm:$0xff]  ;;  %v1164_v5 = vld [vmem:[%s216_s28 + $0x30] sm:$0xff]  ;;  %802 = vmatprep.subr.bf16.mxu0 %v1003_v24  ;;  %785 = vmatprep.mubr.msk.f32.mxu0 %vm1004_vm0, %v1005_v25  ;;  %vm309_vm1 = vcmask 523264   ;;  %vm384_vm2 = vcmask 31744   ;;  %vm409_vm3 = vcmask 1043456  }
  0x3a   : > { %v1166_v6 = vld [vmem:[%s216_s28 + $0x38] sm:$0xff]  ;;  %v277_v7 = vadd.f32 %v1162_v4, %v1158_v2  ;;  %v1170_v8 = vld [vmem:[%s216_s28 + $0x10] sm:$0xff]  ;;  %v1182_v14 = vld [vmem:[%s216_s28 + $0x40] sm:$0xff]  ;;  %v1006_v60 = vmov 0   ;;  %s1270_s10 = scalar_lea.vmem [#allocation5], %s732_s25  ;;  %s750_s25 = sshll.u32 %s1061_s22, 11 }
  0x3b   : > { %v1172_v9 = vld [vmem:[%s216_s28 + $0x18] sm:$0xff]  ;;  %284 = vadd.xlane.f32.xlu1 %v283_v3  ;;  %v286_v10 = vadd.f32 %v1166_v6, %v1164_v5  ;;  %v1178_v12 = vld [vmem:[%s216_s28 + $0x50] sm:$0xff]  ;;  %v1184_v15 = vld [vmem:[%s216_s28 + $0x48] sm:$0xff]  ;;  %868 = vset.pattern.permute.xlu0 %v1006_v60  ;;  %s652_s11 = sshll.u32 %s1270_s10, 4  ;;  %s1301_s26 = scalar_lea.hbm %s1356_s5, %s750_s25  ;;  %s1303_s11 = int_to_ptr.vmem [resolvable:$true] %s652_s11 }
  0x3c   : > { %278 = vadd.xlane.f32.xlu0 %v277_v7  ;;  %v280_v11 = vadd.f32 %v1172_v9, %v1170_v8  ;;  %v1180_v13 = vld [vmem:[%s216_s28 + $0x58] sm:$0xff]  ;;  %v289_v17 = vadd.f32 %v1184_v15, %v1182_v14  ;;  %v1190_v18 = vld [vmem:[%s216_s28 + $0x70] sm:$0xff]  ;;  %v1194_v20 = vld [vmem:[%s216_s28 + $0x60] sm:$0xff]  ;;  %869 = vset.pattern.permute.xlu1 %v1006_v60  ;;  %s639_s22 = scalar_lea.sflag [#allocation4], %s1144_s23  ;;  %p1363_p11 = scmp.ne.s32.totalorder %s1360_s30, 0 }
  0x3d   : > { %v292_v16 = vadd.f32 %v1180_v13, %v1178_v12  ;;  %v1192_v19 = vld [vmem:[%s216_s28 + $0x78] sm:$0xff]  ;;  %v1196_v21 = vld [vmem:[%s216_s28 + $0x68] sm:$0xff]  ;;  %v243_v46 = vld [vmem:[%s1352_s1] sm:$0xf]  ;;  %s932_s28 = scalar_lea.vmem %s1303_s11, 2048  ;;  %s1007_s29 = smov [#allocation5]  }
  0x3e   : > { %v298_v22 = vadd.f32 %v1192_v19, %v1190_v18  ;;  %v295_v23 = vadd.f32 %v1196_v21, %v1194_v20  ;;  %v245_v47 = vld [vmem:[%s1354_s3] sm:$0xff]  ;;  %v246_v53 = vld [vmem:[%s1354_s3 + $0x8] sm:$0xff]  ;;  %v247_v54 = vld [vmem:[%s1354_s3 + $0x10] sm:$0xff]  ;;  %p933_p6 = scmp.ne.s32.totalorder %s1303_s11, %s932_s28  ;;  %s936_s12 = sshll.u32 %s1007_s29, 4  ;;  %s937_s12 = int_to_ptr.vmem [resolvable:$false] %s936_s12 }
  0x3f   : > { %287 = vadd.xlane.f32.xlu1 %v286_v10  ;;  %790 = vmatprep.mubr.msk.f32.mxu1 %vm384_vm2, %v245_v47  ;;  %v244_v48 = vld [vmem:[%s1353_s2] sm:$0xf]  ;;  %v248_v55 = vld [vmem:[%s1354_s3 + $0x18] sm:$0xff]  ;;  %v250_v57 = vld [vmem:[%s1354_s3 + $0x28] sm:$0xff]  ;;  %s938_s14 = scalar_lea.vmem %s937_s12, 4096  ;;  %p939_p8 = scmp.lt.s32.totalorder %s1303_s11, %s937_s12 }
  0x40   : > { %281 = vadd.xlane.f32.xlu0 %v280_v11  ;;  %v249_v56 = vld [vmem:[%s1354_s3 + $0x20] sm:$0xff]  ;;  %v251_v58 = vld [vmem:[%s1354_s3 + $0x30] sm:$0xff]  ;;  %v252_v59 = vld [vmem:[%s1354_s3 + $0x38] sm:$0xff]  ;;  %p934_p12 = pnand %p933_p6, %p1363_p11  ;;  %p940_p10 = scmp.lt.s32.totalorder %s938_s14, %s932_s28 }
  0x41   : > { %v254_v61 = vld [vmem:[%s1355_s4 + $0x8] sm:$0xff]  ;;  %v253_v62 = vld [vmem:[%s1355_s4] sm:$0xff]  ;;  %v256_v11 = vld [vmem:[%s1355_s4 + $0x18] sm:$0xff] }
  0x42   : > { %p935_p13 = pneg %p934_p12  ;;  %p941_p0 = por %p940_p10, %p939_p8 }
  0x43   : > { %293 = vadd.xlane.f32.xlu1 %v292_v16 }
  0x44   : > { %290 = vadd.xlane.f32.xlu0 %v289_v17  ;;  %v255_v17 = vld [vmem:[%s1355_s4 + $0x10] sm:$0xff]  ;;  %p942_p2 = pnand %p941_p0, %p935_p13 }
  0x47   : > { %299 = vadd.xlane.f32.xlu1 %v298_v22 }
  0x48   : > { %296 = vadd.xlane.f32.xlu0 %v295_v23 }
  0xc8   : > { %v285_v26 = vpop.xlane.xlu1 %284 }
  0xc9   : > { %v279_v27 = vpop.xlane.xlu0 %278  ;;  %v303_v32 = vmul.f32 0.00390625, %v285_v26 }
  0xca   : > { %v301_v30 = vmul.f32 0.00390625, %v279_v27 }
  0xcc   : > { %v288_v28 = vpop.xlane.xlu1 %287 }
  0xcd   : > { %v282_v29 = vpop.xlane.xlu0 %281  ;;  %v304_v33 = vmul.f32 0.00390625, %v288_v28 }
  0xce   : > { %v302_v31 = vmul.f32 0.00390625, %v282_v29  ;;  %v258_v29 = vld [vmem:[%s1355_s4 + $0x28] sm:$0xff] }
  0xcf   : > { %v806_v39 = vpack.c.bf16 %v304_v33, %v303_v32 }
  0xd0   : > { %v803_v34 = vpack.c.bf16 %v302_v31, %v301_v30  ;;  %v294_v35 = vpop.xlane.xlu1 %293  ;;  %v257_v31 = vld [vmem:[%s1355_s4 + $0x20] sm:$0xff] }
  0xd1   : > { %v291_v36 = vpop.xlane.xlu0 %290  ;;  %v306_v37 = vmul.f32 0.00390625, %v294_v35 }
  0xd2   : > { %804 = vmatpush3.bf16.msra.mxu0 %v803_v34  ;;  %v305_v38 = vmul.f32 0.00390625, %v291_v36 }
  0xd3   : > { %805 = vmatprep.subr.bf16.mxu0 %v1003_v24 }
  0xd4   : > { %v300_v40 = vpop.xlane.xlu1 %299  ;;  %v809_v42 = vpack.c.bf16 %v306_v37, %v305_v38 }
  0xd5   : > { %v297_v41 = vpop.xlane.xlu0 %296  ;;  %v308_v43 = vmul.f32 0.00390625, %v300_v40  ;;  %v259_v40 = vld [vmem:[%s1355_s4 + $0x30] sm:$0xff] }
  0xd6   : > { %807 = vmatpush3.bf16.msra.mxu0 %v806_v39  ;;  %v307_v44 = vmul.f32 0.00390625, %v297_v41 }
  0xd7   : > { %808 = vmatprep.subr.bf16.mxu0 %v1003_v24 }
  0xd8   : > { %v812_v45 = vpack.c.bf16 %v308_v43, %v307_v44 }
  0xda   : > { %810 = vmatpush3.bf16.msra.mxu0 %v809_v42  ;;  %v260_v42 = vld [vmem:[%s1355_s4 + $0x38] sm:$0xff] }
  0xdb   : > { %811 = vmatprep.subr.bf16.mxu0 %v1003_v24 }
  0xde   : > { %813 = vmatpush3.bf16.msra.mxu0 %v812_v45 }
  0xe1   : > { %786 = vmatmul.mubr.msk.f32.vlgmr.msra.gmra.mrb[0].mxu0 %vm309_vm1, %v243_v46 }
 0x1b4   : > { %v379_v49 = vpop.f32.mrb[0].mxu0 }
 0x1b5   : > { %v380_v50 = vadd.f32 %v379_v49, %v244_v48  ;;  %v787_v51 = vpop.f32.mrb[1].mxu0 }
 0x1b7   : > { %v383_v52 = vmax.f32 %v380_v50, 0.0 }
 0x1b9   : > { %788 = vmatprep.subr.msk.mxu1 %vm409_vm3, %v383_v52 }
 0x1ba   : > { %789 = vmatpush3.msk.msra.mxu1 %vm409_vm3, %v383_v52 }
 0x1bb   : > { %791 = vmatmul.mubr.msk.f32.vlgmr.msra.gmra.mrb[0].mxu1 %vm384_vm2, %v246_v53 }
 0x1bc   : > { %793 = vmatprep.mubr.msk.f32.mxu1 %vm384_vm2, %v247_v54 }
 0x1bf   : > { %794 = vmatmul.mubr.msk.f32.gmra.mrb[2].mxu1 %vm384_vm2, %v248_v55 }
 0x1c0   : > { %796 = vmatprep.mubr.msk.f32.mxu1 %vm384_vm2, %v249_v56 }
 0x1c3   : > { %797 = vmatmul.mubr.msk.f32.gmra.mrb[4].mxu1 %vm384_vm2, %v250_v57 }
 0x1c4   : > { %799 = vmatprep.mubr.msk.f32.mxu1 %vm384_vm2, %v251_v58 }
 0x1c7   : > { %800 = vmatmul.mubr.msk.f32.gmra.mrb[6].mxu1 %vm384_vm2, %v252_v59 }
 0x28e   : > { %v792_v63 = vpop.f32.mrb[0].mxu1 }
 0x28f   : > { %v485_v3 = vadd.f32 %v792_v63, %v254_v61  ;;  %v479_v7 = vpop.f32.mrb[1].mxu1 }
 0x290   : > { %v480_v10 = vadd.f32 %v479_v7, %v253_v62 }
 0x291   : > { %v519_v16 = vsub.f32 0.0, %v485_v3 }
 0x292   : > { %v518_v22 = vsub.f32 0.0, %v480_v10  ;;  %v795_v23 = vpop.f32.mrb[2].mxu1 }
 0x293   : > { %v528_v24 = vmul.f32 1.442695, %v519_v16  ;;  %v495_v25 = vadd.f32 %v795_v23, %v256_v11  ;;  %v489_v26 = vpop.f32.mrb[3].mxu1 }
 0x294   : > { %v526_v27 = vmul.f32 1.442695, %v518_v22  ;;  %v490_v28 = vadd.f32 %v489_v26, %v255_v17 }
 0x295   : > { %870 = vpow2.f32 %v528_v24  ;;  %v521_v30 = vsub.f32 0.0, %v495_v25 }
 0x296   : > { %872 = vpow2.f32 %v526_v27  ;;  %v520_v32 = vsub.f32 0.0, %v490_v28  ;;  %v798_v33 = vpop.f32.mrb[4].mxu1 }
 0x297   : > { %v532_v34 = vmul.f32 1.442695, %v521_v30  ;;  %v505_v35 = vadd.f32 %v798_v33, %v258_v29  ;;  %v499_v36 = vpop.f32.mrb[5].mxu1 }
 0x298   : > { %v530_v37 = vmul.f32 1.442695, %v520_v32  ;;  %v500_v38 = vadd.f32 %v499_v36, %v257_v31 }
 0x299   : > { %874 = vpow2.f32 %v532_v34  ;;  %v523_v39 = vsub.f32 0.0, %v505_v35 }
 0x29a   : > { %876 = vpow2.f32 %v530_v37  ;;  %v522_v41 = vsub.f32 0.0, %v500_v38  ;;  %v801_v43 = vpop.f32.mrb[6].mxu1 }
 0x29b   : > { %v536_v44 = vmul.f32 1.442695, %v523_v39  ;;  %v509_v45 = vpop.f32.mrb[7].mxu1  ;;  %v515_v48 = vadd.f32 %v801_v43, %v260_v42 }
 0x29c   : > { %v510_v46 = vadd.f32 %v509_v45, %v259_v40  ;;  %v534_v47 = vmul.f32 1.442695, %v522_v41 }
 0x29d   : > { %878 = vpow2.f32 %v536_v44  ;;  %v525_v55 = vsub.f32 0.0, %v515_v48 }
 0x29e   : > { %v524_v49 = vsub.f32 0.0, %v510_v46  ;;  %880 = vpow2.f32 %v534_v47 }
 0x29f   : > { %v871_v50 = vpop.eup %870  ;;  %v540_v59 = vmul.f32 1.442695, %v525_v55 }
 0x2a0   : > { %v873_v51 = vpop.eup %872  ;;  %v543_v52 = vadd.f32 1.0, %v871_v50  ;;  %v538_v53 = vmul.f32 1.442695, %v524_v49 }
 0x2a1   : > { %v542_v54 = vadd.f32 1.0, %v873_v51 }
 0x2a2   : > { %882 = vrcp.f32 %v543_v52 }
 0x2a3   : > { %v875_v56 = vpop.eup %874  ;;  %884 = vrcp.f32 %v542_v54 }
 0x2a4   : > { %v877_v57 = vpop.eup %876  ;;  %v545_v58 = vadd.f32 1.0, %v875_v56  ;;  %886 = vpow2.f32 %v538_v53 }
 0x2a5   : > { %v544_v60 = vadd.f32 1.0, %v877_v57 }
 0x2a6   : > { %888 = vrcp.f32 %v545_v58 }
 0x2a7   : > { %v879_v61 = vpop.eup %878  ;;  %890 = vpow2.f32 %v540_v59 }
 0x2a8   : > { %v547_v62 = vadd.f32 1.0, %v879_v61  ;;  %892 = vrcp.f32 %v544_v60  ;;  %v881_v63 = vpop.eup %880 }
 0x2a9   : > { %v546_v11 = vadd.f32 1.0, %v881_v63 }
 0x2aa   : > { %894 = vrcp.f32 %v547_v62 }
 0x2ab   : > { %896 = vrcp.f32 %v546_v11 }
 0x2ac   : > { %v883_v3 = vpop.eup %882 }
 0x2ad   : > { %v885_v7 = vpop.eup %884  ;;  %573 = vperm.xlu1 %869, %v883_v3  }
 0x2ae   : > { %v887_v10 = vpop.eup %886  ;;  %568 = vperm.xlu0 %868, %v885_v7  }
 0x2af   : > { %v548_v17 = vadd.f32 1.0, %v887_v10 }
 0x2b0   : > { %v889_v16 = vpop.eup %888 }
 0x2b1   : > { %583 = vperm.xlu1 %869, %v889_v16   ;;  %v891_v22 = vpop.eup %890  ;;  %898 = vrcp.f32 %v548_v17 }
 0x2b2   : > { %v893_v23 = vpop.eup %892  ;;  %v549_v25 = vadd.f32 1.0, %v891_v22 }
 0x2b4   : > { %v895_v24 = vpop.eup %894  ;;  %900 = vrcp.f32 %v549_v25 }
 0x2b5   : > { %578 = vperm.xlu1 %869, %v893_v23   ;;  %v897_v26 = vpop.eup %896 }
 0x2b9   : > { %593 = vperm.xlu1 %869, %v895_v24  }
 0x2bb   : > { %v899_v27 = vpop.eup %898 }
 0x2bd   : > { %588 = vperm.xlu1 %869, %v897_v26  }
 0x2be   : > { %v901_v28 = vpop.eup %900 }
 0x2c1   : > { %598 = vperm.xlu1 %869, %v899_v27  }
 0x2c5   : > { %603 = vperm.xlu1 %869, %v901_v28  }
 0x32c   : > { %v574_v29 = vpop.permute.xlu1 %573 }
 0x32d   : > { %v608_v30 = vmul.f32 %v574_v29, %v1170_v8  ;;  %v609_v31 = vmul.f32 %v574_v29, %v1172_v9  ;;  %v569_v32 = vpop.permute.xlu0 %568 }
 0x32e   : > { %v606_v33 = vmul.f32 %v569_v32, %v1158_v2  ;;  %v607_v34 = vmul.f32 %v569_v32, %v1162_v4 }
 0x32f   : > { %624 = vst [vmem:[%s1270_s10 + $0x10] sm:$0xff] %v608_v30  ;;  %625 = vst [vmem:[%s1270_s10 + $0x18] sm:$0xff] %v609_v31 }
 0x330   : > { %622 = vst [vmem:[%s1270_s10] sm:$0xff] %v606_v33  ;;  %623 = vst [vmem:[%s1270_s10 + $0x8] sm:$0xff] %v607_v34  ;;  %v584_v2 = vpop.permute.xlu1 %583 }
 0x331   : > { %v612_v4 = vmul.f32 %v584_v2, %v1164_v5  ;;  %v613_v8 = vmul.f32 %v584_v2, %v1166_v6 }
 0x333   : > { %628 = vst [vmem:[%s1270_s10 + $0x30] sm:$0xff] %v612_v4  ;;  %629 = vst [vmem:[%s1270_s10 + $0x38] sm:$0xff] %v613_v8 }
 0x334   : > { %v579_v9 = vpop.permute.xlu1 %578 }
 0x335   : > { %v610_v35 = vmul.f32 %v579_v9, %v1154_v0  ;;  %v611_v36 = vmul.f32 %v579_v9, %v1156_v1 }
 0x337   : > { %626 = vst [vmem:[%s1270_s10 + $0x20] sm:$0xff] %v610_v35  ;;  %627 = vst [vmem:[%s1270_s10 + $0x28] sm:$0xff] %v611_v36 }
 0x338   : > { %v594_v37 = vpop.permute.xlu1 %593 }
 0x339   : > { %v616_v5 = vmul.f32 %v594_v37, %v1178_v12  ;;  %v617_v6 = vmul.f32 %v594_v37, %v1180_v13 }
 0x33b   : > { %632 = vst [vmem:[%s1270_s10 + $0x50] sm:$0xff] %v616_v5  ;;  %633 = vst [vmem:[%s1270_s10 + $0x58] sm:$0xff] %v617_v6 }
 0x33c   : > { %v589_v38 = vpop.permute.xlu1 %588 }
 0x33d   : > { %v614_v39 = vmul.f32 %v589_v38, %v1182_v14  ;;  %v615_v0 = vmul.f32 %v589_v38, %v1184_v15 }
 0x33f   : > { %630 = vst [vmem:[%s1270_s10 + $0x40] sm:$0xff] %v614_v39  ;;  %631 = vst [vmem:[%s1270_s10 + $0x48] sm:$0xff] %v615_v0 }
 0x340   : > { %v599_v1 = vpop.permute.xlu1 %598 }
 0x341   : > { %v618_v40 = vmul.f32 %v599_v1, %v1194_v20  ;;  %v619_v12 = vmul.f32 %v599_v1, %v1196_v21 }
 0x343   : > { %634 = vst [vmem:[%s1270_s10 + $0x60] sm:$0xff] %v618_v40  ;;  %635 = vst [vmem:[%s1270_s10 + $0x68] sm:$0xff] %v619_v12 }
 0x344   : > { %v604_v13 = vpop.permute.xlu1 %603 }
 0x345   : > { %v620_v14 = vmul.f32 %v604_v13, %v1190_v18  ;;  %v621_v15 = vmul.f32 %v604_v13, %v1192_v19 }
 0x347   : > { %636 = vst [vmem:[%s1270_s10 + $0x70] sm:$0xff] %v620_v14  ;;  %637 = vst [vmem:[%s1270_s10 + $0x78] sm:$0xff] %v621_v15 }
 0x348   : > { %945 = shalt.err (!%p942_p2)
}
 0x349   : > { %s946_s15 = scalar_lea.hbm %s1301_s26, 2048  ;;  %s950_s7 = scalar_lea.hbm %s1356_s5, 4096 }
 0x34a   : > { %p947_p4 = scmp.ne.s32.totalorder %s1301_s26, %s946_s15  ;;  %p951_p9 = scmp.lt.u32.totalorder %s1301_s26, %s1356_s5 }
 0x34b   : > { %p952_p1 = scmp.lt.u32.totalorder %s950_s7, %s946_s15  ;;  %p954_p6 = scmp.lt.u32.totalorder %s946_s15, %s1301_s26 }
 0x34c   : > { %p948_p5 = pnand %p947_p4, %p1363_p11 }
 0x34d   : > { %p953_p3 = por %p952_p1, %p951_p9 }
 0x34e   : > { %p949_p7 = pneg %p948_p5 }
 0x34f   : > { %p955_p12 = por %p954_p6, %p953_p3 }
 0x351   : > { %p956_p13 = pnand %p955_p12, %p949_p7 }
 0x353   : > { %959 = shalt.err (!%p956_p13)
}
 0x354   : > { %s1008_s25 = smov 256   ;;  %s1009_s13 = smov 16  }
 0x355   : > { %816 = dma.vmem_to_hbm [thread:$0]  (%p1363_p11), %s1303_s11, 2048, %s1301_s26, %s639_s22, %s1008_s25, %s1008_s25, %s1009_s13  }
 0x356 PF: > { %s667_s17 = sand.u32 1, %s986_s18   ;;  %p1364_p8 = scmp.ne.s32.totalorder %s1361_s6, 0 }
 0x357   : > { %p1365_p10 = scmp.ge.s32.totalorder %s998_s21, 2  ;;  %s668_s28 = scalar_lea.sflag [#allocation4], %s667_s17 }
 0x359   : > { %p823_p0 = pnand %p1365_p10, %p1364_p8 }
 0x35b   : > { %981 = dma.done.wait (!%p823_p0), %s668_s28, 2048  }
 0x35c   : > { %983 = vsyncadd (!%p823_p0), %s668_s28, 4294965248  ;;  %p18_p2 = scmp.ge.s32.totalorder %s1065_s24, 4   ;;  %s1366_s18 = smov %s990_s19 }
 0x35d   : > { %s1367_s19 = smov %s994_s20  ;;  %s1368_s20 = smov %s1077_s27 }
 0x35e   : > { %s1369_s21 = smov %s1065_s24  ;;  %20 = sbr.rel (!%p18_p2) target bundleno = 5 (0x5), region = 85 }
 0x365   :  { %673 = vsyncpa [#allocation3], 1 }
 0x366   :  { %675 = vsyncpa [#allocation3 + $0x1], 1 }
 0x367   :  { %676 = vsyncpa [#allocation4], 1 }
 0x368   :  { %678 = vsyncpa [#allocation4 + $0x1], 1 }

</bundles_post_ra>
